<compile_context>
chip_gen: v6e
topology: v6e:2x2x1
jax: 0.10.0
libtpu: 0.0.40
codegen_flags: <defaults>
</compile_context>

<pallas_src>
import functools

import jax
import jax.numpy as jnp
from jax import lax
from jax.experimental import pallas as pl
from jax.experimental.pallas import tpu as pltpu

_MB = 1024 * 1024


def _round_up(x, m):
    return (x + m - 1) // m * m


def _vmem_capacity_bytes():
    """Physical per-core VMEM; conservative (v7x-sized) fallback if query fails."""
    try:
        info = pltpu.get_tpu_info()
        cap = getattr(info, "vmem_capacity_bytes", None)
        if cap:
            return int(cap)
    except Exception:
        pass
    return 64 * _MB


def prepare_swiglu_params(w12, b12, w3, b3, *, weight_dtype=jnp.bfloat16):
    """One-time weight preparation (call at model init, NOT per forward).

    Inputs (nn.Linear native layout):
      w12: [2*H, C_in], b12: [2*H], w3: [C_out, H], b3: [C_out]
    Returns:
      w12p: [2, H_pad, C_in] weight_dtype   (W1 = w12p[0], W2 = w12p[1])
      b12p: [2, H_pad]       float32
      w3p:  [C_out, H_pad]   weight_dtype
      b3p:  [1, C_out]       float32
    H_pad = H rounded up to a multiple of 128; padded hidden units have zero
    weights and zero bias so they contribute exactly 0 to the output.
    """
    two_h, c_in = w12.shape
    hidden = two_h // 2
    c_out = w3.shape[0]
    hidden_pad = _round_up(max(hidden, 128), 128)
    pad_h = hidden_pad - hidden

    w12r = w12.reshape(2, hidden, c_in)
    b12r = b12.reshape(2, hidden)
    if pad_h:
        w12r = jnp.pad(w12r, ((0, 0), (0, pad_h), (0, 0)))
        b12r = jnp.pad(b12r, ((0, 0), (0, pad_h)))
        w3 = jnp.pad(w3, ((0, 0), (0, pad_h)))

    return (w12r.astype(weight_dtype),
            b12r.astype(jnp.float32),
            w3.astype(weight_dtype),
            b3.reshape(1, c_out).astype(jnp.float32))


def _swiglu_kernel(x_ref, w12_ref, b12_ref, w3_ref, b3_ref, o_ref,
                   acc_ref, xc_ref, *, matmul_dtype):
    # x_ref:   (tm, C_in)      token tile, resident across the H axis
    # w12_ref: (2, th, C_in)   rows [j*th, (j+1)*th) of W1 (slot 0) / W2 (slot 1)
    # b12_ref: (2, th)         matching bias slices (f32)
    # w3_ref:  (C_out, th)     cols [j*th, (j+1)*th) of W3
    # b3_ref:  (1, C_out)
    # o_ref:   (tm, C_out)
    # acc_ref: (tm, C_out) f32 accumulator over the hidden-dim grid axis
    # xc_ref:  (tm, C_in)      x cast to matmul_dtype once per M tile
    j = pl.program_id(1)

    @pl.when(j == 0)
    def _():
        acc_ref[...] = jnp.zeros_like(acc_ref)
        xc_ref[...] = x_ref[...].astype(matmul_dtype)   # cast hoisted out of H loop

    dn = (((1,), (1,)), ((), ()))  # contract last dims (x @ W^T), no batch

    x = xc_ref[...]
    b12 = b12_ref[...]                                  # (2, th) f32
    w1 = w12_ref[0].astype(matmul_dtype)
    w2 = w12_ref[1].astype(matmul_dtype)

    h1 = lax.dot_general(x, w1, dn, preferred_element_type=jnp.float32) + b12[0:1, :]
    h2 = lax.dot_general(x, w2, dn, preferred_element_type=jnp.float32) + b12[1:2, :]

    # SiLU(h1) * h2 in f32; only the second-matmul input is narrowed.
    hid = (h1 * jax.nn.sigmoid(h1) * h2).astype(matmul_dtype)

    w3 = w3_ref[...].astype(matmul_dtype)
    acc_ref[...] += lax.dot_general(hid, w3, dn, preferred_element_type=jnp.float32)

    @pl.when(j == pl.num_programs(1) - 1)
    def _():
        o_ref[...] = (acc_ref[...] + b3_ref[...]).astype(o_ref.dtype)


@functools.partial(jax.jit,
                   static_argnames=("tm", "th", "matmul_dtype", "weight_buffers"))
def swiglu_ffn(x, w12p, b12p, w3p, b3p, *, tm=None, th=None,
               matmul_dtype=jnp.bfloat16, weight_buffers=2):
    """SwiGLU FFN forward on prepared params (see prepare_swiglu_params).

    x: [..., C_in]; returns [..., C_out].
    Grid: (M tiles ["parallel"], H tiles ["arbitrary", reduction last]).
    """
    orig_shape = x.shape
    c_in = orig_shape[-1]
    x2d = x.reshape(-1, c_in)
    m = x2d.shape[0]

    hidden_pad = w12p.shape[1]
    c_out = w3p.shape[0]

    # ---- VMEM budget / default token tile, derived from the actual part ----
    cap = _vmem_capacity_bytes()
    budget = int(min(cap - 16 * _MB, 96 * _MB))      # headroom for compiler temps
    big_vmem = cap >= 100 * _MB                      # 128 MiB parts vs v7x (64 MiB)

    if tm is None:
        tm = 512 if big_vmem else 256
    tm_eff = min(tm, _round_up(m, 8))
    m_pad = _round_up(m, tm_eff)
    # TODO(synk): on v7x small-batch inference, split a lone M tile in two so both
    # TensorCores get work via the "parallel" axis.

    # ---- hidden tile: largest 128-multiple divisor of H_pad that fits ------
    if th is None:
        # Big-VMEM parts: try the weights-resident config (single H block ->
        # constant weight block indices -> weights DMA'd from HBM exactly once).
        th_req = hidden_pad if big_vmem else 512
    else:
        th_req = th
    th_req = max(128, min(th_req, hidden_pad))

    x_b = jnp.dtype(x.dtype).itemsize
    w_b = jnp.dtype(w12p.dtype).itemsize
    mm_b = jnp.dtype(matmul_dtype).itemsize
    nbuf = max(2, weight_buffers)

    def _vmem_use(th_c):
        use = 2 * tm_eff * c_in * x_b                # x tile (double-buffered)
        use += nbuf * 2 * th_c * c_in * w_b          # w12 block
        use += nbuf * 2 * th_c * 4                   # b12 block
        use += nbuf * c_out * th_c * w_b             # w3 block
        use += 2 * c_out * 4                         # b3
        use += 2 * tm_eff * c_out * x_b              # out tile
        use += tm_eff * c_out * 4                    # accumulator scratch
        use += tm_eff * c_in * mm_b                  # x-cast scratch
        use += 3 * tm_eff * th_c * 4                 # h1/h2/hidden temporaries
        return use

    n128 = hidden_pad // 128
    th_eff = 128
    for d in range(min(th_req // 128, n128), 0, -1):
        if n128 % d == 0 and _vmem_use(d * 128) <= 0.9 * budget:
            th_eff = d * 128
            break
    n_hblk = hidden_pad // th_eff

    grid = (m_pad // tm_eff, n_hblk)

    # TODO(synk): mask the final ragged M tile in-kernel instead of padding x /
    # slicing the output (only matters at training-scale M).
    if m_pad != m:
        x2d = jnp.pad(x2d, ((0, m_pad - m), (0, 0)))

    def _wspec(shape, index_map):
        # Optional deeper buffering of the big weight streams (v5e knob).
        if weight_buffers != 2:
            return pl.BlockSpec(shape, index_map,
                                pipeline_mode=pl.Buffered(weight_buffers))
        return pl.BlockSpec(shape, index_map)

    kernel = functools.partial(_swiglu_kernel, matmul_dtype=matmul_dtype)

    out2d = pl.pallas_call(
        kernel,
        out_shape=jax.ShapeDtypeStruct((m_pad, c_out), x.dtype),
        grid_spec=pltpu.PrefetchScalarGridSpec(
            num_scalar_prefetch=0,
            grid=grid,
            in_specs=[
                # x tile: constant across j -> resident over the H loop.
                pl.BlockSpec((tm_eff, c_in), lambda i, j: (i, 0)),
                # W1/W2: one fused block per step, streamed along H.
                # (Constant over the whole grid when n_hblk == 1 -> resident.)
                _wspec((2, th_eff, c_in), lambda i, j: (0, j, 0)),
                pl.BlockSpec((2, th_eff), lambda i, j: (0, j)),        # b1/b2
                _wspec((c_out, th_eff), lambda i, j: (0, j)),          # W3
                pl.BlockSpec((1, c_out), lambda i, j: (0, 0)),         # b3
            ],
            out_specs=pl.BlockSpec((tm_eff, c_out), lambda i, j: (i, 0)),
            scratch_shapes=[
                pltpu.VMEM((tm_eff, c_out), jnp.float32),   # f32 accumulator
                pltpu.VMEM((tm_eff, c_in), matmul_dtype),   # hoisted x cast
            ],
        ),
        compiler_params=pltpu.CompilerParams(
            dimension_semantics=("parallel", "arbitrary"),
            vmem_limit_bytes=budget,
        ),
    )(x2d, w12p, b12p, w3p, b3p)

    if m_pad != m:
        out2d = out2d[:m]
    return out2d.reshape(*orig_shape[:-1], c_out)


def _reference(x, w12, b12, w3, b3):
    x12 = jnp.einsum("...i,oi->...o", x, w12) + b12
    h = w12.shape[0] // 2
    x1, x2 = x12[..., :h], x12[..., h:]
    hid = x1 * jax.nn.sigmoid(x1) * x2
    return jnp.einsum("...i,oi->...o", hid, w3) + b3


if __name__ == "__main__":
    key = jax.random.PRNGKey(0)

    def make_params(k, c_in, h, c_out):
        k_w12, k_b12, k_w3, k_b3 = jax.random.split(k, 4)
        w12 = jax.random.normal(k_w12, (2 * h, c_in), jnp.float32) * 0.05
        b12 = jax.random.normal(k_b12, (2 * h,), jnp.float32) * 0.05
        w3 = jax.random.normal(k_w3, (c_out, h), jnp.float32) * 0.05
        b3 = jax.random.normal(k_b3, (c_out,), jnp.float32) * 0.05
        return w12, b12, w3, b3

    # --- case 1: small shape, f32 weights + f32 MXU path, tight tolerance ----
    k1, k2, key = jax.random.split(key, 3)
    B, N, c_in, h, c_out = 2, 8, 32, 64, 32
    x = jax.random.normal(k1, (B, N, c_in), jnp.float32)
    w12, b12, w3, b3 = make_params(k2, c_in, h, c_out)
    ref = _reference(x, w12, b12, w3, b3)

    p_f32 = prepare_swiglu_params(w12, b12, w3, b3, weight_dtype=jnp.float32)
    out_f32 = swiglu_ffn(x, *p_f32, matmul_dtype=jnp.float32)
    jax.block_until_ready(out_f32)
    assert out_f32.shape == (B, N, c_out)
    assert jnp.allclose(out_f32, ref, atol=1e-4, rtol=1e-4), "f32 mismatch"

    # --- case 2: same shape, bf16 weights + bf16 MXU (production config) -----
    p_bf16 = prepare_swiglu_params(w12, b12, w3, b3)
    out_bf16 = swiglu_ffn(x, *p_bf16)
    jax.block_until_ready(out_bf16)
    assert jnp.allclose(out_bf16, ref, atol=2e-2, rtol=2e-2), "bf16 mismatch"

    # --- case 3: ragged tokens (ViT-style 257) + non-128 hidden (H padding) +
    #             explicit small tiles so both grid axes have >1 block ---------
    k3, k4, key = jax.random.split(key, 3)
    B, N, c_in, h, c_out = 2, 257, 64, 200, 64
    x = jax.random.normal(k3, (B, N, c_in), jnp.float32)
    w12, b12, w3, b3 = make_params(k4, c_in, h, c_out)
    p = prepare_swiglu_params(w12, b12, w3, b3)
    out = swiglu_ffn(x, *p, tm=128, th=128)   # grid = (5, 2); H padded 200 -> 256
    jax.block_until_ready(out)
    ref = _reference(x, w12, b12, w3, b3)
    assert out.shape == (B, N, c_out)
    assert jnp.allclose(out, ref, atol=2e-2, rtol=2e-2), "ragged/padded-H mismatch"

    print("KERNEL_OK")
</pallas_src>

<mosaic_0001>
module attributes {stable_mosaic.version = 11 : i64} {
  func.func @_swiglu_kernel(%arg0: i32, %arg1: i32, %arg2: memref<16x32xf32, #tpu.memory_space<vmem>>, %arg3: memref<2x128x32xf32, #tpu.memory_space<vmem>>, %arg4: memref<2x128xf32, #tpu.memory_space<vmem>>, %arg5: memref<32x128xf32, #tpu.memory_space<vmem>>, %arg6: memref<1x32xf32, #tpu.memory_space<vmem>>, %arg7: memref<16x32xf32, #tpu.memory_space<vmem>>, %arg8: memref<16x32xf32, #tpu.memory_space<vmem>>, %arg9: memref<16x32xf32, #tpu.memory_space<vmem>>) attributes {dimension_semantics = [#tpu.dimension_semantics<parallel>, #tpu.dimension_semantics<arbitrary>], iteration_bounds = array<i64: 1, 1>, scalar_prefetch = 0 : i64, scratch_operands = 2 : i64, tpu.core_type = #tpu.core_type<tc>, window_params = [{transform_indices = @transform_0, window_bounds = array<i64: 16, 32>}, {transform_indices = @transform_1, window_bounds = array<i64: 2, 128, 32>}, {transform_indices = @transform_2, window_bounds = array<i64: 2, 128>}, {transform_indices = @transform_3, window_bounds = array<i64: 32, 128>}, {pipeline_mode = #tpu.pipeline_mode<synchronous>, transform_indices = @transform_4, window_bounds = array<i64: 1, 32>}, {transform_indices = @transform_5, window_bounds = array<i64: 16, 32>}]} {
    %c0_i32 = arith.constant 0 : i32
    %0 = arith.cmpi eq, %arg1, %c0_i32 : i32
    %1 = arith.extui %0 : i1 to i32
    %c0_i32_0 = arith.constant 0 : i32
    %2 = arith.cmpi ne, %1, %c0_i32_0 : i32
    scf.if %2 {
      %cst_20 = arith.constant 0.000000e+00 : f32
      %32 = vector.broadcast %cst_20 : f32 to vector<16x32xf32>
      %c0_21 = arith.constant 0 : index
      %c0_22 = arith.constant 0 : index
      %33 = vector.load %arg8[%c0_21, %c0_22] : memref<16x32xf32, #tpu.memory_space<vmem>>, vector<16x32xf32>
      tpu.vector_store %arg8[%c0_21, %c0_22], %32 {strides = array<i32>} : memref<16x32xf32, #tpu.memory_space<vmem>>, vector<16x32xf32>,
      %c0_23 = arith.constant 0 : index
      %c0_24 = arith.constant 0 : index
      %34 = vector.load %arg2[%c0_23, %c0_24] : memref<16x32xf32, #tpu.memory_space<vmem>>, vector<16x32xf32>
      %c0_25 = arith.constant 0 : index
      %c0_26 = arith.constant 0 : index
      %35 = vector.load %arg9[%c0_25, %c0_26] : memref<16x32xf32, #tpu.memory_space<vmem>>, vector<16x32xf32>
      tpu.vector_store %arg9[%c0_25, %c0_26], %34 {strides = array<i32>} : memref<16x32xf32, #tpu.memory_space<vmem>>, vector<16x32xf32>,
    } else {
    }
    %c0 = arith.constant 0 : index
    %c0_1 = arith.constant 0 : index
    %3 = vector.load %arg9[%c0, %c0_1] : memref<16x32xf32, #tpu.memory_space<vmem>>, vector<16x32xf32>
    %c0_2 = arith.constant 0 : index
    %c0_3 = arith.constant 0 : index
    %4 = vector.load %arg4[%c0_2, %c0_3] : memref<2x128xf32, #tpu.memory_space<vmem>>, vector<2x128xf32>
    %c0_4 = arith.constant 0 : index
    %c0_5 = arith.constant 0 : index
    %c0_6 = arith.constant 0 : index
    %5 = vector.load %arg3[%c0_4, %c0_5, %c0_6] : memref<2x128x32xf32, #tpu.memory_space<vmem>>, vector<1x128x32xf32>
    %6 = vector.shape_cast %5 : vector<1x128x32xf32> to vector<128x32xf32>
    %c1 = arith.constant 1 : index
    %c0_7 = arith.constant 0 : index
    %c0_8 = arith.constant 0 : index
    %7 = vector.load %arg3[%c1, %c0_7, %c0_8] : memref<2x128x32xf32, #tpu.memory_space<vmem>>, vector<1x128x32xf32>
    %8 = vector.shape_cast %7 : vector<1x128x32xf32> to vector<128x32xf32>
    %cst = arith.constant dense<0.000000e+00> : vector<16x128xf32>
    %9 = tpu.matmul %3, %6, %cst {dimension_numbers = #tpu.dot_dimension_numbers<[1], [1], [0], [0], [0, 0, 1, 0], [], []>} : vector<16x32xf32>, vector<128x32xf32>, vector<16x128xf32> -> vector<16x128xf32>
    %10 = vector.extract_strided_slice %4 {offsets = [0, 0], sizes = [1, 128], strides = [1, 1]} : vector<2x128xf32> to vector<1x128xf32>
    %11 = vector.broadcast %10 : vector<1x128xf32> to vector<16x128xf32>
    %12 = arith.addf %9, %11 : vector<16x128xf32>
    %cst_9 = arith.constant dense<0.000000e+00> : vector<16x128xf32>
    %13 = tpu.matmul %3, %8, %cst_9 {dimension_numbers = #tpu.dot_dimension_numbers<[1], [1], [0], [0], [0, 0, 1, 0], [], []>} : vector<16x32xf32>, vector<128x32xf32>, vector<16x128xf32> -> vector<16x128xf32>
    %14 = vector.extract_strided_slice %4 {offsets = [1, 0], sizes = [1, 128], strides = [1, 1]} : vector<2x128xf32> to vector<1x128xf32>
    %15 = vector.broadcast %14 : vector<1x128xf32> to vector<16x128xf32>
    %16 = arith.addf %13, %15 : vector<16x128xf32>
    %17 = arith.negf %12 : vector<16x128xf32>
    %18 = math.exp %17 : vector<16x128xf32>
    %cst_10 = arith.constant 1.000000e+00 : f32
    %19 = vector.broadcast %cst_10 : f32 to vector<16x128xf32>
    %20 = arith.addf %19, %18 : vector<16x128xf32>
    %21 = arith.divf %19, %20 : vector<16x128xf32>
    %22 = arith.mulf %12, %21 : vector<16x128xf32>
    %23 = arith.mulf %22, %16 : vector<16x128xf32>
    %c0_11 = arith.constant 0 : index
    %c0_12 = arith.constant 0 : index
    %24 = vector.load %arg5[%c0_11, %c0_12] : memref<32x128xf32, #tpu.memory_space<vmem>>, vector<32x128xf32>
    %c0_13 = arith.constant 0 : index
    %c0_14 = arith.constant 0 : index
    %25 = vector.load %arg8[%c0_13, %c0_14] : memref<16x32xf32, #tpu.memory_space<vmem>>, vector<16x32xf32>
    %cst_15 = arith.constant dense<0.000000e+00> : vector<16x32xf32>
    %26 = tpu.matmul %23, %24, %cst_15 {dimension_numbers = #tpu.dot_dimension_numbers<[1], [1], [0], [0], [0, 0, 1, 0], [], []>} : vector<16x128xf32>, vector<32x128xf32>, vector<16x32xf32> -> vector<16x32xf32>
    %27 = arith.addf %25, %26 : vector<16x32xf32>
    %c0_16 = arith.constant 0 : index
    %c0_17 = arith.constant 0 : index
    %28 = vector.load %arg8[%c0_16, %c0_17] : memref<16x32xf32, #tpu.memory_space<vmem>>, vector<16x32xf32>
    tpu.vector_store %arg8[%c0_16, %c0_17], %27 {strides = array<i32>} : memref<16x32xf32, #tpu.memory_space<vmem>>, vector<16x32xf32>,
    %c0_i32_18 = arith.constant 0 : i32
    %29 = arith.cmpi eq, %arg1, %c0_i32_18 : i32
    %30 = arith.extui %29 : i1 to i32
    %c0_i32_19 = arith.constant 0 : i32
    %31 = arith.cmpi ne, %30, %c0_i32_19 : i32
    scf.if %31 {
      %c0_20 = arith.constant 0 : index
      %c0_21 = arith.constant 0 : index
      %32 = vector.load %arg8[%c0_20, %c0_21] : memref<16x32xf32, #tpu.memory_space<vmem>>, vector<16x32xf32>
      %c0_22 = arith.constant 0 : index
      %c0_23 = arith.constant 0 : index
      %33 = vector.load %arg6[%c0_22, %c0_23] : memref<1x32xf32, #tpu.memory_space<vmem>>, vector<1x32xf32>
      %34 = vector.broadcast %33 : vector<1x32xf32> to vector<16x32xf32>
      %35 = arith.addf %32, %34 : vector<16x32xf32>
      %c0_24 = arith.constant 0 : index
      %c0_25 = arith.constant 0 : index
      %36 = vector.load %arg7[%c0_24, %c0_25] : memref<16x32xf32, #tpu.memory_space<vmem>>, vector<16x32xf32>
      tpu.vector_store %arg7[%c0_24, %c0_25], %35 {strides = array<i32>} : memref<16x32xf32, #tpu.memory_space<vmem>>, vector<16x32xf32>,
    } else {
    }
    return
  }
  func.func @transform_0(%arg0: i32, %arg1: i32) -> (i32, i32) {
    %c0_i32 = arith.constant 0 : i32
    %c0_i32_0 = arith.constant 0 : i32
    return %arg0, %c0_i32 : i32, i32
  }
  func.func @transform_1(%arg0: i32, %arg1: i32) -> (i32, i32, i32) {
    %c0_i32 = arith.constant 0 : i32
    %c0_i32_0 = arith.constant 0 : i32
    %c0_i32_1 = arith.constant 0 : i32
    return %c0_i32, %arg1, %c0_i32_0 : i32, i32, i32
  }
  func.func @transform_2(%arg0: i32, %arg1: i32) -> (i32, i32) {
    %c0_i32 = arith.constant 0 : i32
    %c0_i32_0 = arith.constant 0 : i32
    return %c0_i32, %arg1 : i32, i32
  }
  func.func @transform_3(%arg0: i32, %arg1: i32) -> (i32, i32) {
    %c0_i32 = arith.constant 0 : i32
    %c0_i32_0 = arith.constant 0 : i32
    return %c0_i32, %arg1 : i32, i32
  }
  func.func @transform_4(%arg0: i32, %arg1: i32) -> (i32, i32) {
    %c0_i32 = arith.constant 0 : i32
    %c0_i32_0 = arith.constant 0 : i32
    %c0_i32_1 = arith.constant 0 : i32
    return %c0_i32, %c0_i32_0 : i32, i32
  }
  func.func @transform_5(%arg0: i32, %arg1: i32) -> (i32, i32) {
    %c0_i32 = arith.constant 0 : i32
    %c0_i32_0 = arith.constant 0 : i32
    return %arg0, %c0_i32 : i32, i32
  }
}

</mosaic_0001>

<bundles_post_ra>
// kernel: swiglu_ffn.1
= control target key start
LH: loop header
LB: loop body
LE: loop exit
PB: predicated region body
PF: predicated region fallthrough
CT: control target
= control target key end

     0   :  { %vm25_vm0 = vcmask 261120   ;;  %s907_s0 = inlined_call_operand.vmem [shape: f32[16,32], index: 0, kind: input, shape index: {}]   ;;  %s908_s1 = inlined_call_operand.vmem [shape: f32[2,128,32], index: 1, kind: input, shape index: {}]   ;;  %s909_s2 = inlined_call_operand.vmem [shape: f32[2,128], index: 2, kind: input, shape index: {}]   ;;  %s910_s3 = inlined_call_operand.vmem [shape: f32[32,128], index: 3, kind: input, shape index: {}]   ;;  %s911_s4 = inlined_call_operand.vmem [shape: f32[1,32], index: 4, kind: input, shape index: {}]   ;;  %s912_s5 = inlined_call_operand.hbm [shape: f32[16,32], index: 5, kind: output, shape index: {}]  }
   0x1   :  { %v50_v0 = vld [vmem:[%s908_s1 + $0x78] sm:$0xff]  ;;  %v49_v1 = vld [vmem:[%s908_s1 + $0x70] sm:$0xff]  ;;  %v48_v4 = vld [vmem:[%s908_s1 + $0x68] sm:$0xff] }
   0x2   :  { %559 = vmatprep.subr.msk.mxu0 %vm25_vm0, %v50_v0  ;;  %v477_v2 = vld [vmem:[%s908_s1 + $0xf8] sm:$0xff]  ;;  %v476_v3 = vld [vmem:[%s908_s1 + $0xf0] sm:$0xff]  ;;  %v475_v5 = vld [vmem:[%s908_s1 + $0xe8] sm:$0xff] }
   0x3   :  { %560 = vmatpush3.xpose.msk.msra.mxu0 %vm25_vm0, %v50_v0  ;;  %594 = vmatprep.subr.msk.mxu1 %vm25_vm0, %v477_v2  ;;  %v47_v6 = vld [vmem:[%s908_s1 + $0x60] sm:$0xff]  ;;  %v29_v8 = vld [vmem:[%s907_s0 + $0x8] sm:$0xff] }
   0x4   :  { %561 = vmatprep.subr.msk.mxu0 %vm25_vm0, %v49_v1  ;;  %595 = vmatpush3.xpose.msk.msra.mxu1 %vm25_vm0, %v477_v2  ;;  %v28_v7 = vld [vmem:[%s907_s0] sm:$0xff]  ;;  %31 = vst.msk [vmem:[#allocation3 + $0x8] sm:$0xff] %vm25_vm0, %v29_v8 }
   0x5   :  { %596 = vmatprep.subr.msk.mxu1 %vm25_vm0, %v476_v3  ;;  %30 = vst.msk [vmem:[#allocation3] sm:$0xff] %vm25_vm0, %v28_v7  ;;  %v474_v9 = vld [vmem:[%s908_s1 + $0xe0] sm:$0xff] }
   0x7   :  { %562 = vmatpush3.xpose.msk.msra.mxu0 %vm25_vm0, %v49_v1 }
   0x8   :  { %563 = vmatprep.subr.msk.mxu0 %vm25_vm0, %v48_v4  ;;  %597 = vmatpush3.xpose.msk.msra.mxu1 %vm25_vm0, %v476_v3 }
   0x9   :  { %598 = vmatprep.subr.msk.mxu1 %vm25_vm0, %v475_v5 }
   0xb   :  { %564 = vmatpush3.xpose.msk.msra.mxu0 %vm25_vm0, %v48_v4 }
   0xc   :  { %565 = vmatprep.subr.msk.mxu0 %vm25_vm0, %v47_v6 }
   0xd   :  { %10 = vsyncpa [#allocation5], 0  ;;  %v46_v10 = vld [vmem:[%s908_s1 + $0x58] sm:$0xff]  ;;  %599 = vmatpush3.xpose.msk.msra.mxu1 %vm25_vm0, %v475_v5  ;;  %v45_v12 = vld [vmem:[%s908_s1 + $0x50] sm:$0xff]  ;;  %v674_v40 = vmov 0.0   ;;  %v68_v41 = vlaneseq  ;;  %s675_s17 = smov [#allocation4]  }
   0xe   :  { %600 = vmatprep.subr.msk.mxu1 %vm25_vm0, %v474_v9  ;;  %v473_v11 = vld [vmem:[%s908_s1 + $0xd8] sm:$0xff]  ;;  %v32_v13 = vld [vmem:[#allocation3] sm:$0xff]  ;;  %v44_v15 = vld [vmem:[%s908_s1 + $0x48] sm:$0xff]  ;;  %27 = vst.msk [vmem:[#allocation2 + $0x8] sm:$0xff] %vm25_vm0, %v674_v40  ;;  %s451_s18 = sshll.u32 %s675_s17, 4  ;;  %s452_s18 = int_to_ptr.vmem [resolvable:$true] %s451_s18 }
   0xf   :  { %566 = vmatpush3.xpose.msk.msra.mxu0 %vm25_vm0, %v47_v6  ;;  %591 = vmatprep.mubr.msk.f32.mxu0 %vm25_vm0, %v32_v13  ;;  %v472_v14 = vld [vmem:[%s908_s1 + $0xd0] sm:$0xff]  ;;  %v471_v16 = vld [vmem:[%s908_s1 + $0xc8] sm:$0xff]  ;;  %v43_v17 = vld [vmem:[%s908_s1 + $0x40] sm:$0xff]  ;;  %26 = vst.msk [vmem:[#allocation2] sm:$0xff] %vm25_vm0, %v674_v40  ;;  %v69_v42 = vshrl.u32 %v68_v41, 7  ;;  %s652_s19 = scalar_lea.vmem %s452_s18, 256  ;;  %p657_p1 = scmp.lt.s32.totalorder %s452_s18, %s452_s18 }
  0x10   :  { %567 = vmatprep.subr.msk.mxu0 %vm25_vm0, %v46_v10  ;;  %626 = vmatprep.mubr.msk.f32.mxu1 %vm25_vm0, %v32_v13  ;;  %v470_v18 = vld [vmem:[%s908_s1 + $0xc0] sm:$0xff]  ;;  %v42_v19 = vld [vmem:[%s908_s1 + $0x38] sm:$0xff]  ;;  %v41_v21 = vld [vmem:[%s908_s1 + $0x30] sm:$0xff]  ;;  %p653_p0 = scmp.ne.s32.totalorder %s452_s18, %s652_s19  ;;  %p658_p2 = scmp.lt.s32.totalorder %s652_s19, %s652_s19 }
  0x11   :  { %601 = vmatpush3.xpose.msk.msra.mxu1 %vm25_vm0, %v474_v9  ;;  %v469_v20 = vld [vmem:[%s908_s1 + $0xb8] sm:$0xff]  ;;  %v468_v22 = vld [vmem:[%s908_s1 + $0xb0] sm:$0xff]  ;;  %v40_v23 = vld [vmem:[%s908_s1 + $0x28] sm:$0xff]  ;;  %v70_v43 = vsub.s32 0, %v69_v42  ;;  %v204_v56 = vsub.s32 1, %v69_v42 }
  0x12   :  { %602 = vmatprep.subr.msk.mxu1 %vm25_vm0, %v473_v11  ;;  %v467_v24 = vld [vmem:[%s908_s1 + $0xa8] sm:$0xff]  ;;  %v39_v25 = vld [vmem:[%s908_s1 + $0x20] sm:$0xff]  ;;  %v38_v27 = vld [vmem:[%s908_s1 + $0x18] sm:$0xff]  ;;  %p659_p3 = por %p658_p2, %p657_p1 }
  0x13   :  { %568 = vmatpush3.xpose.msk.msra.mxu0 %vm25_vm0, %v46_v10  ;;  %v466_v26 = vld [vmem:[%s908_s1 + $0xa0] sm:$0xff]  ;;  %v465_v28 = vld [vmem:[%s908_s1 + $0x98] sm:$0xff]  ;;  %v37_v29 = vld [vmem:[%s908_s1 + $0x10] sm:$0xff] }
  0x14   :  { %569 = vmatprep.subr.msk.mxu0 %vm25_vm0, %v45_v12  ;;  %v464_v30 = vld [vmem:[%s908_s1 + $0x90] sm:$0xff]  ;;  %v36_v31 = vld [vmem:[%s908_s1 + $0x8] sm:$0xff]  ;;  %v35_v33 = vld [vmem:[%s908_s1] sm:$0xff]  ;;  %p660_p4 = pnand %p659_p3, %p653_p0 }
  0x15   :  { %603 = vmatpush3.xpose.msk.msra.mxu1 %vm25_vm0, %v473_v11  ;;  %v463_v32 = vld [vmem:[%s908_s1 + $0x88] sm:$0xff]  ;;  %v462_v34 = vld [vmem:[%s908_s1 + $0x80] sm:$0xff]  ;;  %v33_v35 = vld [vmem:[#allocation3 + $0x8] sm:$0xff] }
  0x16   :  { %604 = vmatprep.subr.msk.mxu1 %vm25_vm0, %v472_v14  ;;  %v348_v36 = vld [vmem:[%s910_s3 + $0x18] sm:$0xff]  ;;  %v347_v37 = vld [vmem:[%s910_s3 + $0x10] sm:$0xff]  ;;  %v346_v38 = vld [vmem:[%s910_s3 + $0x8] sm:$0xff] }
  0x17   :  { %570 = vmatpush3.xpose.msk.msra.mxu0 %vm25_vm0, %v45_v12  ;;  %v345_v39 = vld [vmem:[%s910_s3] sm:$0xff]  ;;  %v350_v4 = vld [vmem:[#allocation2 + $0x8] sm:$0xff] }
  0x18   :  { %571 = vmatprep.subr.msk.mxu0 %vm25_vm0, %v44_v15  ;;  %v34_v44 = vld [vmem:[%s909_s2] sm:$0x3] }
  0x19   :  { %605 = vmatpush3.xpose.msk.msra.mxu1 %vm25_vm0, %v472_v14  ;;  %v71_v45 = vrot.slane %v34_v44, %v70_v43  ;;  %v205_v58 = vrot.slane %v34_v44, %v204_v56  ;;  %v349_v6 = vld [vmem:[#allocation2] sm:$0xff] }
  0x1a   :  { %606 = vmatprep.subr.msk.mxu1 %vm25_vm0, %v471_v16  ;;  %v516_v10 = vld [vmem:[%s911_s4] ss:$0 sm:$0xff] }
  0x1b   :  { %572 = vmatpush3.xpose.msk.msra.mxu0 %vm25_vm0, %v44_v15 }
  0x1c   :  { %573 = vmatprep.subr.msk.mxu0 %vm25_vm0, %v43_v17 }
  0x1d   :  { %607 = vmatpush3.xpose.msk.msra.mxu1 %vm25_vm0, %v471_v16 }
  0x1e   :  { %608 = vmatprep.subr.msk.mxu1 %vm25_vm0, %v470_v18 }
  0x1f   :  { %574 = vmatpush3.xpose.msk.msra.mxu0 %vm25_vm0, %v43_v17 }
  0x20   :  { %575 = vmatprep.subr.msk.mxu0 %vm25_vm0, %v42_v19 }
  0x21   :  { %609 = vmatpush3.xpose.msk.msra.mxu1 %vm25_vm0, %v470_v18 }
  0x22   :  { %610 = vmatprep.subr.msk.mxu1 %vm25_vm0, %v469_v20 }
  0x23   :  { %576 = vmatpush3.xpose.msk.msra.mxu0 %vm25_vm0, %v42_v19 }
  0x24   :  { %577 = vmatprep.subr.msk.mxu0 %vm25_vm0, %v41_v21 }
  0x25   :  { %611 = vmatpush3.xpose.msk.msra.mxu1 %vm25_vm0, %v469_v20 }
  0x26   :  { %612 = vmatprep.subr.msk.mxu1 %vm25_vm0, %v468_v22 }
  0x27   :  { %578 = vmatpush3.xpose.msk.msra.mxu0 %vm25_vm0, %v41_v21 }
  0x28   :  { %579 = vmatprep.subr.msk.mxu0 %vm25_vm0, %v40_v23 }
  0x29   :  { %613 = vmatpush3.xpose.msk.msra.mxu1 %vm25_vm0, %v468_v22 }
  0x2a   :  { %614 = vmatprep.subr.msk.mxu1 %vm25_vm0, %v467_v24 }
  0x2b   :  { %580 = vmatpush3.xpose.msk.msra.mxu0 %vm25_vm0, %v40_v23 }
  0x2c   :  { %581 = vmatprep.subr.msk.mxu0 %vm25_vm0, %v39_v25 }
  0x2d   :  { %615 = vmatpush3.xpose.msk.msra.mxu1 %vm25_vm0, %v467_v24 }
  0x2e   :  { %616 = vmatprep.subr.msk.mxu1 %vm25_vm0, %v466_v26 }
  0x2f   :  { %582 = vmatpush3.xpose.msk.msra.mxu0 %vm25_vm0, %v39_v25 }
  0x30   :  { %583 = vmatprep.subr.msk.mxu0 %vm25_vm0, %v38_v27 }
  0x31   :  { %617 = vmatpush3.xpose.msk.msra.mxu1 %vm25_vm0, %v466_v26 }
  0x32   :  { %618 = vmatprep.subr.msk.mxu1 %vm25_vm0, %v465_v28 }
  0x33   :  { %584 = vmatpush3.xpose.msk.msra.mxu0 %vm25_vm0, %v38_v27 }
  0x34   :  { %585 = vmatprep.subr.msk.mxu0 %vm25_vm0, %v37_v29 }
  0x35   :  { %619 = vmatpush3.xpose.msk.msra.mxu1 %vm25_vm0, %v465_v28 }
  0x36   :  { %620 = vmatprep.subr.msk.mxu1 %vm25_vm0, %v464_v30 }
  0x37   :  { %586 = vmatpush3.xpose.msk.msra.mxu0 %vm25_vm0, %v37_v29 }
  0x38   :  { %587 = vmatprep.subr.msk.mxu0 %vm25_vm0, %v36_v31 }
  0x39   :  { %621 = vmatpush3.xpose.msk.msra.mxu1 %vm25_vm0, %v464_v30 }
  0x3a   :  { %622 = vmatprep.subr.msk.mxu1 %vm25_vm0, %v463_v32 }
  0x3b   :  { %588 = vmatpush3.xpose.msk.msra.mxu0 %vm25_vm0, %v36_v31 }
  0x3c   :  { %589 = vmatprep.subr.msk.mxu0 %vm25_vm0, %v35_v33 }
  0x3d   :  { %623 = vmatpush3.xpose.msk.msra.mxu1 %vm25_vm0, %v463_v32 }
  0x3e   :  { %624 = vmatprep.subr.msk.mxu1 %vm25_vm0, %v462_v34 }
  0x3f   :  { %590 = vmatpush3.xpose.msk.msra.mxu0 %vm25_vm0, %v35_v33 }
  0x40   :  { %629 = vmatprep.subr.mxu0 %v348_v36 }
  0x41   :  { %625 = vmatpush3.xpose.msk.msra.mxu1 %vm25_vm0, %v462_v34 }
  0x42   :  { %592 = vmatmul.mubr.msk.f32.vlgmr.msra.gmra.mxu0 %vm25_vm0, %v33_v35 }
  0x43   :  { %630 = vmatpush3.xpose.msra.mxu0 %v348_v36 }
  0x44   :  { %627 = vmatmul.mubr.msk.f32.vlgmr.msra.gmra.mxu1 %vm25_vm0, %v33_v35  ;;  %631 = vmatprep.subr.mxu0 %v347_v37 }
  0x47   :  { %632 = vmatpush3.xpose.msra.mxu0 %v347_v37 }
  0x48   :  { %633 = vmatprep.subr.mxu0 %v346_v38 }
  0x4b   :  { %634 = vmatpush3.xpose.msra.mxu0 %v346_v38 }
  0x4c   :  { %635 = vmatprep.subr.mxu0 %v345_v39 }
  0x4f   :  { %636 = vmatpush3.xpose.msra.mxu0 %v345_v39 }
 0x102   :  { %v593_v46 = vpop.f32.mrf.mxu0 }
 0x103   :  { %v199_v47 = vadd.f32 %v593_v46, %v71_v45 }
 0x104   :  { %v193_v48 = vpop.f32.mrf.mxu0  ;;  %v628_v57 = vpop.f32.mrf.mxu1 }
 0x105   :  { %v515_v49 = vmul.f32 -1.442695, %v199_v47  ;;  %v194_v50 = vadd.f32 %v193_v48, %v71_v45  ;;  %v326_v63 = vadd.f32 %v628_v57, %v205_v58 }
 0x106   :  { %v320_v60 = vpop.f32.mrf.mxu1 }
 0x107   :  { %644 = vpow2.f32 %v515_v49  ;;  %v514_v51 = vmul.f32 -1.442695, %v194_v50  ;;  %v321_v1 = vadd.f32 %v320_v60, %v205_v58 }
 0x109   :  { %646 = vpow2.f32 %v514_v51 }
 0x114   :  { %v645_v52 = vpop.eup %644 }
 0x115   :  { %v336_v53 = vadd.f32 1.0, %v645_v52 }
 0x116   :  { %v647_v54 = vpop.eup %646 }
 0x117   :  { %648 = vrcp.f32 %v336_v53  ;;  %v335_v55 = vadd.f32 1.0, %v647_v54 }
 0x119   :  { %650 = vrcp.f32 %v335_v55 }
 0x124   :  { %v649_v59 = vpop.eup %648 }
 0x125   :  { %v342_v62 = vmul.f32 %v649_v59, %v199_v47 }
 0x126   :  { %v651_v61 = vpop.eup %650 }
 0x127   :  { %v341_v0 = vmul.f32 %v651_v61, %v194_v50  ;;  %v344_v3 = vmul.f32 %v342_v62, %v326_v63 }
 0x129   :  { %v343_v2 = vmul.f32 %v341_v0, %v321_v1 }
 0x12b   :  { %637 = vmatprep.mubr.f32.mxu0 %v343_v2 }
 0x12c   :  { %638 = vmatmul.mubr.f32.vlgmr.msra.gmra.mxu0 %v344_v3 }
 0x1ec   :  { %v639_v5 = vpop.f32.mrf.mxu0 }
 0x1ed   :  { %v427_v7 = vadd.f32 %v639_v5, %v350_v4 }
 0x1ee   :  { %v417_v8 = vpop.f32.mrf.mxu0 }
 0x1ef   :  { %429 = vst.msk [vmem:[#allocation2 + $0x8] sm:$0xff] %vm25_vm0, %v427_v7  ;;  %v426_v9 = vadd.f32 %v417_v8, %v349_v6 }
 0x1f1   :  { %428 = vst.msk [vmem:[#allocation2] sm:$0xff] %vm25_vm0, %v426_v9 }
 0x1f6   :  { %v434_v11 = vld [vmem:[#allocation2 + $0x8] sm:$0xff] }
 0x1f7   :  { %v443_v12 = vadd.f32 %v516_v10, %v434_v11 }
 0x1f8   :  { %v433_v13 = vld [vmem:[#allocation2] sm:$0xff] }
 0x1f9   :  { %v442_v14 = vadd.f32 %v516_v10, %v433_v13  ;;  %445 = vst.msk [vmem:[#allocation4 + $0x8] sm:$0xff] %vm25_vm0, %v443_v12 }
 0x1fb   :  { %444 = vst.msk [vmem:[#allocation4] sm:$0xff] %vm25_vm0, %v442_v14 }
 0x1fc   :  { %663 = shalt.err (!%p660_p4)
}
 0x1fd   :  { %s676_s20 = smov 128   ;;  %s677_s4 = smov 8  }
 0x1fe   :  { %457 = dma.vmem_to_hbm [thread:$0]  %s452_s18, 256, %s912_s5, [#allocation5], %s676_s20, %s676_s20, %s677_s4  }
 0x1ff   :  { %672 = dma.done.wait [#allocation5], 256  }
 0x200   :  { %673 = vsyncadd [#allocation5], 4294967040 }
 0x201   :  { %461 = vsyncpa [#allocation5], 1 }

</bundles_post_ra>
